<compile_context>
chip_gen: v7x
topology: tpu7x:2x2x1
jax: 0.10.0
libtpu: 0.0.40
codegen_flags: <defaults>
</compile_context>

<pallas_src>
import functools

import jax
import jax.numpy as jnp
from jax.experimental import pallas as pl
from jax.experimental.pallas import tpu as pltpu


def _rup(x, m):
    return -(-x // m) * m


# ----------------- fused matmul (+BN scale/bias, +residual, +ReLU) -----------------

def _mm_body(a_ref, b_ref, s_ref, c_ref, r_ref, o_ref, relu):
    k = pl.program_id(2)

    @pl.when(k == 0)
    def _():
        o_ref[...] = jnp.zeros_like(o_ref)

    # accumulate directly into the resident f32 output block
    o_ref[...] += jnp.dot(a_ref[...], b_ref[...],
                          preferred_element_type=jnp.float32)

    @pl.when(k == pl.num_programs(2) - 1)
    def _():
        y = o_ref[...] * s_ref[...] + c_ref[...]
        if r_ref is not None:
            y = y + r_ref[...]
        if relu:
            y = jnp.maximum(y, 0.0)
        o_ref[...] = y


def _mm_kernel(a_ref, b_ref, s_ref, c_ref, o_ref, *, relu):
    _mm_body(a_ref, b_ref, s_ref, c_ref, None, o_ref, relu)


def _mm_res_kernel(a_ref, b_ref, s_ref, c_ref, r_ref, o_ref, *, relu):
    _mm_body(a_ref, b_ref, s_ref, c_ref, r_ref, o_ref, relu)


@functools.partial(jax.jit, static_argnames=("relu",))
def matmul_fused(a, b, scale, bias, residual=None, *, relu):
    """(M,K)x(K,N) on the MXU; epilogue: out*scale + bias (+residual) (+ReLU)."""
    M, K = a.shape
    _, N = b.shape
    # adaptive tiles: big MXU tiles where dims allow, no 128-padding of tiny M
    tm = min(256, _rup(M, 16))
    tn = min(256, _rup(N, 128))
    tk = min(512, _rup(K, 128))
    Mp, Kp, Np = _rup(M, tm), _rup(K, tk), _rup(N, tn)

    a_p = jnp.pad(a, ((0, Mp - M), (0, Kp - K))).astype(jnp.bfloat16)
    b_p = jnp.pad(b, ((0, Kp - K), (0, Np - N))).astype(jnp.bfloat16)
    s_p = jnp.pad(scale.reshape(1, N).astype(jnp.float32), ((0, 0), (0, Np - N)))
    c_p = jnp.pad(bias.reshape(1, N).astype(jnp.float32), ((0, 0), (0, Np - N)))

    inputs = [a_p, b_p, s_p, c_p]
    in_specs = [pl.BlockSpec((tm, tk), lambda i, j, k: (i, k)),
                pl.BlockSpec((tk, tn), lambda i, j, k: (k, j)),
                pl.BlockSpec((1, tn), lambda i, j, k: (0, j)),
                pl.BlockSpec((1, tn), lambda i, j, k: (0, j))]
    if residual is None:
        kernel = functools.partial(_mm_kernel, relu=relu)
    else:
        r_p = jnp.pad(residual.astype(jnp.float32), ((0, Mp - M), (0, Np - N)))
        inputs.append(r_p)
        in_specs.append(pl.BlockSpec((tm, tn), lambda i, j, k: (i, j)))
        kernel = functools.partial(_mm_res_kernel, relu=relu)

    out = pl.pallas_call(
        kernel,
        out_shape=jax.ShapeDtypeStruct((Mp, Np), jnp.float32),
        grid_spec=pltpu.PrefetchScalarGridSpec(
            num_scalar_prefetch=0,
            grid=(Mp // tm, Np // tn, Kp // tk),
            in_specs=in_specs,
            out_specs=pl.BlockSpec((tm, tn), lambda i, j, k: (i, j))),
        compiler_params=pltpu.CompilerParams(
            dimension_semantics=("parallel", "parallel", "arbitrary")),
    )(*inputs)
    return out[:M, :N]


# ----------------------------- pooling kernels -----------------------------

def _window_max_kernel(x_ref, o_ref):            # (9, tm, C) -> (tm, C)
    o_ref[...] = jnp.max(x_ref[...], axis=0)


@jax.jit
def max_pool_3x3_s2(x):                          # (N,H,W,C) -> (N,Ho,Wo,C)
    N, H, W, C = x.shape
    Ho = (H + 2 - 3) // 2 + 1
    Wo = (W + 2 - 3) // 2 + 1
    xp = jnp.pad(x, ((0, 0), (1, 1), (1, 1), (0, 0)), constant_values=-jnp.inf)
    # TODO(synk): the 9 shifted views are materialized by XLA before the Pallas
    # reduction; a fully fused strided-window Pallas kernel would avoid this.
    views = [xp[:, i:i + 2 * (Ho - 1) + 1:2, j:j + 2 * (Wo - 1) + 1:2, :]
             for i in range(3) for j in range(3)]
    M = N * Ho * Wo
    stacked = jnp.stack(views, axis=0).reshape(9, M, C)
    tm = min(1024, _rup(M, 8))
    Mp = _rup(M, tm)
    stacked = jnp.pad(stacked, ((0, 0), (0, Mp - M), (0, 0)))
    out = pl.pallas_call(
        _window_max_kernel,
        out_shape=jax.ShapeDtypeStruct((Mp, C), x.dtype),
        grid=(Mp // tm,),
        in_specs=[pl.BlockSpec((9, tm, C), lambda i: (0, i, 0))],
        out_specs=pl.BlockSpec((tm, C), lambda i: (i, 0)),
        compiler_params=pltpu.CompilerParams(dimension_semantics=("parallel",)),
    )(stacked)
    return out[:M].reshape(N, Ho, Wo, C)


def _gap_kernel(x_ref, o_ref):                   # (N, HW, tc) -> (N, tc)
    o_ref[...] = jnp.mean(x_ref[...], axis=1)


@jax.jit
def global_avg_pool(x):                          # (N,H,W,C) -> (N,C)
    N, H, W, C = x.shape
    xr = x.reshape(N, H * W, C)
    tc = 512 if C % 512 == 0 else (128 if C % 128 == 0 else C)
    return pl.pallas_call(
        _gap_kernel,
        out_shape=jax.ShapeDtypeStruct((N, C), x.dtype),
        grid=(C // tc,),
        in_specs=[pl.BlockSpec((N, H * W, tc), lambda i: (0, 0, i))],
        out_specs=pl.BlockSpec((N, tc), lambda i: (0, i)),
        compiler_params=pltpu.CompilerParams(dimension_semantics=("parallel",)),
    )(xr)


# ----------------------------- layer building blocks -----------------------------

@functools.partial(jax.jit, static_argnames=("stride", "padding", "relu"))
def conv_bn(x, w, scale, bias, residual=None, *, stride, padding, relu):
    """NHWC conv (no bias) fused with BN scale/bias (+residual) (+ReLU)."""
    N, H, W, Cin = x.shape
    kh, kw, _, Cout = w.shape
    Ho = (H + 2 * padding - kh) // stride + 1
    Wo = (W + 2 * padding - kw) // stride + 1
    x16 = x.astype(jnp.bfloat16)
    if kh == 1 and kw == 1 and padding == 0:
        if stride > 1:
            x16 = x16[:, ::stride, ::stride, :]
        a = x16.reshape(N * Ho * Wo, Cin)
    else:
        # TODO(synk): im2col still materializes kh*kw shifted (bf16) copies in
        # HBM; a tap-indexed BlockSpec / manual-DMA gather would cut this further.
        xp = jnp.pad(x16, ((0, 0), (padding, padding), (padding, padding), (0, 0)))
        cols = [xp[:, i:i + stride * (Ho - 1) + 1:stride,
                    j:j + stride * (Wo - 1) + 1:stride, :]
                for i in range(kh) for j in range(kw)]
        a = jnp.concatenate(cols, axis=-1).reshape(N * Ho * Wo, kh * kw * Cin)
    r = None if residual is None else residual.reshape(N * Ho * Wo, Cout)
    y = matmul_fused(a, w.reshape(kh * kw * Cin, Cout), scale, bias, r, relu=relu)
    return y.reshape(N, Ho, Wo, Cout)


def linear_fused(x, w, b, *, relu):
    return matmul_fused(x, w, jnp.ones_like(b), b, relu=relu)


def bottleneck(x, p):
    out = conv_bn(x, p["conv1_w"], p["bn1"]["scale"], p["bn1"]["bias"],
                  stride=1, padding=0, relu=True)
    out = conv_bn(out, p["conv2_w"], p["bn2"]["scale"], p["bn2"]["bias"],
                  stride=p["stride"], padding=1, relu=True)
    if "down_w" in p:
        idn = conv_bn(x, p["down_w"], p["down_bn"]["scale"], p["down_bn"]["bias"],
                      stride=p["stride"], padding=0, relu=False)
    else:
        idn = x
    # conv3 + bn3 + residual add + ReLU fused into a single matmul epilogue
    return conv_bn(out, p["conv3_w"], p["bn3"]["scale"], p["bn3"]["bias"],
                   residual=idn, stride=1, padding=0, relu=True)


def pneumonia_model_forward(params, x_nchw):
    x = jnp.transpose(x_nchw, (0, 2, 3, 1))                  # NCHW -> NHWC
    out = conv_bn(x, params["conv1_w"], params["bn1"]["scale"],
                  params["bn1"]["bias"], stride=2, padding=3, relu=True)
    out = max_pool_3x3_s2(out)
    for blocks in params["layers"]:
        for bp in blocks:
            out = bottleneck(out, bp)
    feat = global_avg_pool(out)                               # (N, 2048)
    n_fc = len(params["fc"])
    for i, (w, b) in enumerate(params["fc"]):
        feat = linear_fused(feat, w, b, relu=(i < n_fc - 1))
    return feat                                               # (N, 3) logits


# ----------------------------- deterministic parameters -----------------------------

def _bn_params(key, c):
    # TODO(synk): BatchNorm is eval-mode only (running stats folded into a
    # per-channel scale/bias); train-mode batch statistics are not reproduced.
    k1, k2, k3, k4 = jax.random.split(key, 4)
    gamma = 1.0 + 0.1 * jax.random.normal(k1, (c,), jnp.float32)
    beta = 0.1 * jax.random.normal(k2, (c,), jnp.float32)
    mean = 0.1 * jax.random.normal(k3, (c,), jnp.float32)
    var = jax.random.uniform(k4, (c,), jnp.float32, 0.5, 1.5)
    scale = gamma / jnp.sqrt(var + 1e-5)
    return {"scale": scale, "bias": beta - mean * scale}


def _conv_w(key, kh, kw, cin, cout):
    std = (2.0 / (kh * kw * cin)) ** 0.5
    w = std * jax.random.normal(key, (kh, kw, cin, cout), jnp.float32)
    return w.astype(jnp.bfloat16)          # weights pre-cast once for the MXU


def _lin(key, din, dout):
    k1, k2 = jax.random.split(key)
    std = (1.0 / din) ** 0.5
    w = (std * jax.random.normal(k1, (din, dout), jnp.float32)).astype(jnp.bfloat16)
    b = std * jax.random.normal(k2, (dout,), jnp.float32)
    return w, b


def make_params(seed=0):
    root = jax.random.PRNGKey(seed)
    counter = [0]

    def nk():
        counter[0] += 1
        return jax.random.fold_in(root, counter[0])

    params = {"conv1_w": _conv_w(nk(), 7, 7, 1, 64),
              "bn1": _bn_params(nk(), 64)}
    layers_cfg = [(3, 64, 1), (4, 128, 2), (6, 256, 2), (3, 512, 2)]
    in_c = 64
    layers = []
    for n_blocks, mid, stride in layers_cfg:
        blocks = []
        for bi in range(n_blocks):
            s = stride if bi == 0 else 1
            out_c = mid * 4
            bp = {
                "stride": s,
                "conv1_w": _conv_w(nk(), 1, 1, in_c, mid),
                "bn1": _bn_params(nk(), mid),
                "conv2_w": _conv_w(nk(), 3, 3, mid, mid),
                "bn2": _bn_params(nk(), mid),
                "conv3_w": _conv_w(nk(), 1, 1, mid, out_c),
                "bn3": _bn_params(nk(), out_c),
            }
            if bi == 0:
                bp["down_w"] = _conv_w(nk(), 1, 1, in_c, out_c)
                bp["down_bn"] = _bn_params(nk(), out_c)
            blocks.append(bp)
            in_c = out_c
        layers.append(blocks)
    params["layers"] = layers
    dims = [2048, 512, 256, 128, 3]
    params["fc"] = [_lin(nk(), dims[i], dims[i + 1]) for i in range(len(dims) - 1)]
    return params


# ----------------------------- main -----------------------------

if __name__ == "__main__":
    params = make_params(0)
    # 1-channel grayscale chest X-ray, small spatial size (64x64 -> 2x2 before GAP)
    x = jax.random.normal(jax.random.PRNGKey(0), (2, 1, 64, 64), jnp.float32)
    logits = pneumonia_model_forward(params, x)
    logits = jax.block_until_ready(logits)
    assert logits.shape == (2, 3), logits.shape
    assert bool(jnp.all(jnp.isfinite(logits)))
    print("KERNEL_OK")
</pallas_src>

<mosaic_0001>
module attributes {stable_mosaic.version = 11 : i64} {
  func.func @_mm_kernel(%arg0: i32, %arg1: i32, %arg2: i32, %arg3: memref<256x128xbf16, #tpu.memory_space<vmem>>, %arg4: memref<128x128xbf16, #tpu.memory_space<vmem>>, %arg5: memref<1x128xf32, #tpu.memory_space<vmem>>, %arg6: memref<1x128xf32, #tpu.memory_space<vmem>>, %arg7: memref<256x128xf32, #tpu.memory_space<vmem>>) attributes {dimension_semantics = [#tpu.dimension_semantics<parallel>, #tpu.dimension_semantics<parallel>, #tpu.dimension_semantics<arbitrary>], iteration_bounds = array<i64: 8, 1, 1>, scalar_prefetch = 0 : i64, scratch_operands = 0 : i64, tpu.core_type = #tpu.core_type<tc>, window_params = [{transform_indices = @transform_0, window_bounds = array<i64: 256, 128>}, {transform_indices = @transform_1, window_bounds = array<i64: 128, 128>}, {transform_indices = @transform_2, window_bounds = array<i64: 1, 128>}, {transform_indices = @transform_3, window_bounds = array<i64: 1, 128>}, {transform_indices = @transform_4, window_bounds = array<i64: 256, 128>}]} {
    %c0_i32 = arith.constant 0 : i32
    %0 = arith.cmpi eq, %arg2, %c0_i32 : i32
    %1 = arith.extui %0 : i1 to i32
    %c0_i32_0 = arith.constant 0 : i32
    %2 = arith.cmpi ne, %1, %c0_i32_0 : i32
    scf.if %2 {
      %cst_10 = arith.constant 0.000000e+00 : f32
      %12 = vector.broadcast %cst_10 : f32 to vector<256x128xf32>
      %c0_11 = arith.constant 0 : index
      %c0_12 = arith.constant 0 : index
      %13 = vector.load %arg7[%c0_11, %c0_12] : memref<256x128xf32, #tpu.memory_space<vmem>>, vector<256x128xf32>
      tpu.vector_store %arg7[%c0_11, %c0_12], %12 {strides = array<i32>} : memref<256x128xf32, #tpu.memory_space<vmem>>, vector<256x128xf32>,
    } else {
    }
    %c0 = arith.constant 0 : index
    %c0_1 = arith.constant 0 : index
    %3 = vector.load %arg7[%c0, %c0_1] : memref<256x128xf32, #tpu.memory_space<vmem>>, vector<256x128xf32>
    %c0_2 = arith.constant 0 : index
    %c0_3 = arith.constant 0 : index
    %4 = vector.load %arg3[%c0_2, %c0_3] : memref<256x128xbf16, #tpu.memory_space<vmem>>, vector<256x128xbf16>
    %c0_4 = arith.constant 0 : index
    %c0_5 = arith.constant 0 : index
    %5 = vector.load %arg4[%c0_4, %c0_5] : memref<128x128xbf16, #tpu.memory_space<vmem>>, vector<128x128xbf16>
    %cst = arith.constant dense<0.000000e+00> : vector<256x128xf32>
    %6 = tpu.matmul %4, %5, %cst {dimension_numbers = #tpu.dot_dimension_numbers<[1], [0], [0], [1], [0, 0, 1, 1], [], []>} : vector<256x128xbf16>, vector<128x128xbf16>, vector<256x128xf32> -> vector<256x128xf32>
    %7 = arith.addf %3, %6 : vector<256x128xf32>
    %c0_6 = arith.constant 0 : index
    %c0_7 = arith.constant 0 : index
    %8 = vector.load %arg7[%c0_6, %c0_7] : memref<256x128xf32, #tpu.memory_space<vmem>>, vector<256x128xf32>
    tpu.vector_store %arg7[%c0_6, %c0_7], %7 {strides = array<i32>} : memref<256x128xf32, #tpu.memory_space<vmem>>, vector<256x128xf32>,
    %c0_i32_8 = arith.constant 0 : i32
    %9 = arith.cmpi eq, %arg2, %c0_i32_8 : i32
    %10 = arith.extui %9 : i1 to i32
    %c0_i32_9 = arith.constant 0 : i32
    %11 = arith.cmpi ne, %10, %c0_i32_9 : i32
    scf.if %11 {
      %c0_10 = arith.constant 0 : index
      %c0_11 = arith.constant 0 : index
      %12 = vector.load %arg7[%c0_10, %c0_11] : memref<256x128xf32, #tpu.memory_space<vmem>>, vector<256x128xf32>
      %c0_12 = arith.constant 0 : index
      %c0_13 = arith.constant 0 : index
      %13 = vector.load %arg5[%c0_12, %c0_13] : memref<1x128xf32, #tpu.memory_space<vmem>>, vector<1x128xf32>
      %14 = vector.broadcast %13 : vector<1x128xf32> to vector<256x128xf32>
      %15 = arith.mulf %12, %14 : vector<256x128xf32>
      %c0_14 = arith.constant 0 : index
      %c0_15 = arith.constant 0 : index
      %16 = vector.load %arg6[%c0_14, %c0_15] : memref<1x128xf32, #tpu.memory_space<vmem>>, vector<1x128xf32>
      %17 = vector.broadcast %16 : vector<1x128xf32> to vector<256x128xf32>
      %18 = arith.addf %15, %17 : vector<256x128xf32>
      %cst_16 = arith.constant 0.000000e+00 : f32
      %19 = vector.broadcast %cst_16 : f32 to vector<256x128xf32>
      %20 = arith.maximumf %18, %19 : vector<256x128xf32>
      %c0_17 = arith.constant 0 : index
      %c0_18 = arith.constant 0 : index
      %21 = vector.load %arg7[%c0_17, %c0_18] : memref<256x128xf32, #tpu.memory_space<vmem>>, vector<256x128xf32>
      tpu.vector_store %arg7[%c0_17, %c0_18], %20 {strides = array<i32>} : memref<256x128xf32, #tpu.memory_space<vmem>>, vector<256x128xf32>,
    } else {
    }
    return
  }
  func.func @transform_0(%arg0: i32, %arg1: i32, %arg2: i32) -> (i32, i32) {
    %c0_i32 = arith.constant 0 : i32
    return %arg0, %arg2 : i32, i32
  }
  func.func @transform_1(%arg0: i32, %arg1: i32, %arg2: i32) -> (i32, i32) {
    %c0_i32 = arith.constant 0 : i32
    return %arg2, %arg1 : i32, i32
  }
  func.func @transform_2(%arg0: i32, %arg1: i32, %arg2: i32) -> (i32, i32) {
    %c0_i32 = arith.constant 0 : i32
    %c0_i32_0 = arith.constant 0 : i32
    return %c0_i32, %arg1 : i32, i32
  }
  func.func @transform_3(%arg0: i32, %arg1: i32, %arg2: i32) -> (i32, i32) {
    %c0_i32 = arith.constant 0 : i32
    %c0_i32_0 = arith.constant 0 : i32
    return %c0_i32, %arg1 : i32, i32
  }
  func.func @transform_4(%arg0: i32, %arg1: i32, %arg2: i32) -> (i32, i32) {
    %c0_i32 = arith.constant 0 : i32
    return %arg0, %arg1 : i32, i32
  }
}

</mosaic_0001>

<bundles_post_ra>
// kernel: matmul_fused.1
= control target key start
LH: loop header
LB: loop body
LE: loop exit
PB: predicated region body
PF: predicated region fallthrough
CT: control target
= control target key end

     0   :  { %s1312_s15 = smov 0   ;;  %s1314_s16 = smov 0   ;;  %s1499_s0 = inlined_call_operand.vmem [shape: bf16[2048,128], index: 0, kind: input, shape index: {}]   ;;  %s1500_s1 = inlined_call_operand.vmem [shape: bf16[128,128], index: 1, kind: input, shape index: {}]   ;;  %s1501_s2 = inlined_call_operand.vmem [shape: f32[1,128], index: 2, kind: input, shape index: {}]   ;;  %s1502_s3 = inlined_call_operand.vmem [shape: f32[1,128], index: 3, kind: input, shape index: {}]   ;;  %s1503_s4 = inlined_call_operand.vmem [shape: f32[2048,128], index: 4, kind: output, shape index: {}]  }
   0x1   :  { %s1316_s17 = smov 0  }
   0x2 LB: > { %s33_s18 = sadd.s32 1, %s1281_s16  ;;  %p1093_p0 = scmp.ge.s32.totalorder %s1285_s17, 1  ;;  %s1285_s17 = sphi %s1316_s17, %s14_s17   ;;  %s1281_s16 = sphi %s1314_s16, %s1505_s16   ;;  %s1277_s15 = sphi %s1312_s15, %s1504_s15  }
   0x3   : > { %p35_p1 = scmp.ge.s32.totalorder %s33_s18, 8  ;;  %p221_p2 = scmp.lt.s32.totalorder %s1285_s17, 9 }
   0x5   : > { %s1507_s18 = smov (%p35_p1, %s33_s18), 0  ;;  %p222_p3 = pnand %p1093_p0, %p221_p2 }
   0x6   : > { %v1239_v0 = vld [vmem:[%s1500_s1] sm:$0xff] (!%p222_p3)   ;;  %s1094_s21 = sshll.u32 (!%p222_p3), %s1277_s15, 5  ;;  %v1240_v1 = vld [vmem:[%s1500_s1 + $0x8] sm:$0xff] (!%p222_p3)   ;;  %v1241_v2 = vld [vmem:[%s1500_s1 + $0x10] sm:$0xff] (!%p222_p3)  }
   0x7   : > { %225 = sbr.rel (%p222_p3) target bundleno = 285 (0x11d), region = 36  ;;  %p268_p4 = scmp.lt.s32.totalorder (!%p222_p3), %s1094_s21, 255  ;;  %1150 = vmatprep.subr.bf16.mxu0 (!%p222_p3), %v1239_v0  ;;  %1198 = vmatprep.subr.bf16.mxu1 (!%p222_p3), %v1239_v0  ;;  %v1242_v3 = vld [vmem:[%s1500_s1 + $0x18] sm:$0xff] (!%p222_p3)   ;;  %v1243_v6 = vld [vmem:[%s1500_s1 + $0x20] sm:$0xff] (!%p222_p3)   ;;  %v1244_v7 = vld [vmem:[%s1500_s1 + $0x28] sm:$0xff] (!%p222_p3)  }
   0x8   : > { %1151 = vmatpush3.bf16.msra.mxu0 (!%p222_p3), %v1239_v0  ;;  %1206 = vmatpush3.bf16.msra.mxu1 (!%p222_p3), %v1239_v0  ;;  %v1245_v8 = vld [vmem:[%s1500_s1 + $0x30] sm:$0xff] (!%p222_p3)   ;;  %v1246_v9 = vld [vmem:[%s1500_s1 + $0x38] sm:$0xff] (!%p222_p3)   ;;  %v1381_v25 = vld [vmem:[%s1501_s2] ss:$0 sm:$0xff] (!%p222_p3) }
   0x9   : > { %1152 = vmatprep.subr.bf16.mxu0 (!%p222_p3), %v1240_v1  ;;  %1199 = vmatprep.subr.bf16.mxu1 (!%p222_p3), %v1240_v1  ;;  %v1386_v29 = vld [vmem:[%s1502_s3] ss:$0 sm:$0xff] (!%p222_p3) }
   0xc   : > { %1153 = vmatpush3.bf16.msra.mxu0 (!%p222_p3), %v1240_v1  ;;  %1207 = vmatpush3.bf16.msra.mxu1 (!%p222_p3), %v1240_v1 }
   0xd   : > { %1154 = vmatprep.subr.bf16.mxu0 (!%p222_p3), %v1241_v2  ;;  %1200 = vmatprep.subr.bf16.mxu1 (!%p222_p3), %v1241_v2 }
   0xe   : > { %s1509_s21 = smov (!%p268_p4, %s1094_s21), 255 }
   0xf   : > { %s1095_s26 = sshll.u32 %s1509_s21, 2  ;;  %s1097_s22 = sshll.u32 %s1509_s21, 3 }
  0x10   : > { %s1345_s29 = scalar_lea.vmem %s1499_s0, %s1095_s26  ;;  %1155 = vmatpush3.bf16.msra.mxu0 %v1241_v2  ;;  %1208 = vmatpush3.bf16.msra.mxu1 %v1241_v2  ;;  %s1400_s24 = scalar_lea.vmem %s1503_s4, %s1097_s22 }
  0x11   : > { %v1247_v4 = vld [vmem:[%s1345_s29] sm:$0xff]   ;;  %1156 = vmatprep.subr.bf16.mxu0 %v1242_v3  ;;  %1201 = vmatprep.subr.bf16.mxu1 %v1242_v3  ;;  %v1249_v10 = vld [vmem:[%s1345_s29 + $0x8] sm:$0xff]   ;;  %v1251_v12 = vld [vmem:[%s1345_s29 + $0x10] sm:$0xff]  }
  0x12   : > { %v1248_v5 = vld [vmem:[%s1345_s29 + $0x40] sm:$0xff]   ;;  %1166 = vmatprep.mubr.bf16.mxu0 %v1247_v4  ;;  %v1250_v11 = vld [vmem:[%s1345_s29 + $0x48] sm:$0xff]   ;;  %v1252_v13 = vld [vmem:[%s1345_s29 + $0x50] sm:$0xff]  }
  0x13   : > { %1182 = vmatprep.mubr.bf16.mxu1 %v1248_v5  ;;  %v1253_v14 = vld [vmem:[%s1345_s29 + $0x18] sm:$0xff]   ;;  %v1255_v16 = vld [vmem:[%s1345_s29 + $0x20] sm:$0xff]   ;;  %v1257_v18 = vld [vmem:[%s1345_s29 + $0x28] sm:$0xff]  }
  0x14   : > { %1157 = vmatpush3.bf16.msra.mxu0 %v1242_v3  ;;  %1209 = vmatpush3.bf16.msra.mxu1 %v1242_v3  ;;  %v1254_v15 = vld [vmem:[%s1345_s29 + $0x58] sm:$0xff]   ;;  %v1256_v17 = vld [vmem:[%s1345_s29 + $0x60] sm:$0xff]   ;;  %v1258_v19 = vld [vmem:[%s1345_s29 + $0x68] sm:$0xff]  }
  0x15   : > { %1158 = vmatprep.subr.bf16.mxu0 %v1243_v6  ;;  %1202 = vmatprep.subr.bf16.mxu1 %v1243_v6  ;;  %v1259_v20 = vld [vmem:[%s1345_s29 + $0x30] sm:$0xff]   ;;  %v1261_v22 = vld [vmem:[%s1345_s29 + $0x38] sm:$0xff]  }
  0x16   : > { %v1260_v21 = vld [vmem:[%s1345_s29 + $0x70] sm:$0xff]   ;;  %v1262_v23 = vld [vmem:[%s1345_s29 + $0x78] sm:$0xff]  }
  0x18   : > { %1159 = vmatpush3.bf16.msra.mxu0 %v1243_v6  ;;  %1210 = vmatpush3.bf16.msra.mxu1 %v1243_v6 }
  0x19   : > { %1160 = vmatprep.subr.bf16.mxu0 %v1244_v7  ;;  %1203 = vmatprep.subr.bf16.mxu1 %v1244_v7 }
  0x1c   : > { %1161 = vmatpush3.bf16.msra.mxu0 %v1244_v7  ;;  %1211 = vmatpush3.bf16.msra.mxu1 %v1244_v7 }
  0x1d   : > { %1162 = vmatprep.subr.bf16.mxu0 %v1245_v8  ;;  %1204 = vmatprep.subr.bf16.mxu1 %v1245_v8 }
  0x20   : > { %1163 = vmatpush3.bf16.msra.mxu0 %v1245_v8  ;;  %1212 = vmatpush3.bf16.msra.mxu1 %v1245_v8 }
  0x21   : > { %1164 = vmatprep.subr.bf16.mxu0 %v1246_v9  ;;  %1205 = vmatprep.subr.bf16.mxu1 %v1246_v9 }
  0x24   : > { %1165 = vmatpush3.bf16.msra.mxu0 %v1246_v9  ;;  %1213 = vmatpush3.bf16.msra.mxu1 %v1246_v9 }
  0x27   : > { %1167 = vmatmul.mubr.bf16.vlgmr.msra.gmra.mrb[0].mxu0 %v1249_v10  ;;  %1183 = vmatmul.mubr.bf16.vlgmr.msra.gmra.mrb[0].mxu1 %v1250_v11 }
  0x28   : > { %1170 = vmatprep.mubr.bf16.mxu0 %v1251_v12  ;;  %1186 = vmatprep.mubr.bf16.mxu1 %v1252_v13 }
  0x2f   : > { %1171 = vmatmul.mubr.bf16.gmra.mrb[4].mxu0 %v1253_v14  ;;  %1187 = vmatmul.mubr.bf16.gmra.mrb[4].mxu1 %v1254_v15 }
  0x30   : > { %1174 = vmatprep.mubr.bf16.mxu0 %v1255_v16  ;;  %1190 = vmatprep.mubr.bf16.mxu1 %v1256_v17 }
  0x37   : > { %1175 = vmatmul.mubr.bf16.gmra.mrb[8].mxu0 %v1257_v18  ;;  %1191 = vmatmul.mubr.bf16.gmra.mrb[8].mxu1 %v1258_v19 }
  0x38   : > { %1178 = vmatprep.mubr.bf16.mxu0 %v1259_v20  ;;  %1194 = vmatprep.mubr.bf16.mxu1 %v1260_v21 }
  0x3f   : > { %1179 = vmatmul.mubr.bf16.gmra.mrb[12].mxu0 %v1261_v22  ;;  %1195 = vmatmul.mubr.bf16.gmra.mrb[12].mxu1 %v1262_v23 }
  0xfa   : > { %v1168_v24 = vpop.f32.mrb[0].mxu0  ;;  %v1184_v26 = vpop.f32.mrb[0].mxu1 }
  0xfb   : > { %v595_v27 = vpop.f32.mrb[1].mxu0  ;;  %v659_v28 = vpop.f32.mrb[1].mxu1  ;;  %v830_v32 = vmul.f32 %v1168_v24, %v1381_v25  ;;  %v846_v33 = vmul.f32 %v1184_v26, %v1381_v25 }
  0xfc   : > { %v1169_v30 = vpop.f32.mrb[2].mxu0  ;;  %v1185_v31 = vpop.f32.mrb[2].mxu1  ;;  %v828_v36 = vmul.f32 %v1381_v25, %v595_v27  ;;  %v844_v37 = vmul.f32 %v1381_v25, %v659_v28 }
  0xfd   : > { %v598_v34 = vpop.f32.mrb[3].mxu0  ;;  %v662_v35 = vpop.f32.mrb[3].mxu1  ;;  %v869_v38 = vadd.f32 %v1386_v29, %v830_v32  ;;  %v885_v39 = vadd.f32 %v1386_v29, %v846_v33  ;;  %v831_v40 = vmul.f32 %v1169_v30, %v1381_v25  ;;  %v847_v41 = vmul.f32 %v1185_v31, %v1381_v25 }
  0xfe   : > { %v867_v42 = vadd.f32 %v1386_v29, %v828_v36  ;;  %v883_v43 = vadd.f32 %v1386_v29, %v844_v37  ;;  %v829_v44 = vmul.f32 %v1381_v25, %v598_v34  ;;  %v845_v45 = vmul.f32 %v1381_v25, %v662_v35 }
  0xff   : > { %v901_v46 = vmax.f32 %v869_v38, 0.0  ;;  %v917_v47 = vmax.f32 %v885_v39, 0.0  ;;  %v870_v48 = vadd.f32 %v1386_v29, %v831_v40  ;;  %v886_v49 = vadd.f32 %v1386_v29, %v847_v41 }
 0x100   : > { %v899_v50 = vmax.f32 %v867_v42, 0.0  ;;  %v915_v51 = vmax.f32 %v883_v43, 0.0  ;;  %v868_v52 = vadd.f32 %v1386_v29, %v829_v44  ;;  %v884_v53 = vadd.f32 %v1386_v29, %v845_v45 }
 0x101   : > { %933 = vst [vmem:[%s1400_s24 + $0x10] sm:$0xff] %v901_v46  ;;  %949 = vst [vmem:[%s1400_s24 + $0x90] sm:$0xff] %v917_v47  ;;  %v902_v56 = vmax.f32 %v870_v48, 0.0  ;;  %v918_v57 = vmax.f32 %v886_v49, 0.0 }
 0x102   : > { %v1172_v54 = vpop.f32.mrb[4].mxu0  ;;  %v1188_v55 = vpop.f32.mrb[4].mxu1  ;;  %931 = vst [vmem:[%s1400_s24] sm:$0xff] %v899_v50  ;;  %947 = vst [vmem:[%s1400_s24 + $0x80] sm:$0xff] %v915_v51  ;;  %v900_v60 = vmax.f32 %v868_v52, 0.0  ;;  %v916_v61 = vmax.f32 %v884_v53, 0.0 }
 0x103   : > { %v611_v58 = vpop.f32.mrb[5].mxu0  ;;  %v675_v59 = vpop.f32.mrb[5].mxu1  ;;  %934 = vst [vmem:[%s1400_s24 + $0x18] sm:$0xff] %v902_v56  ;;  %950 = vst [vmem:[%s1400_s24 + $0x98] sm:$0xff] %v918_v57  ;;  %v834_v0 = vmul.f32 %v1172_v54, %v1381_v25  ;;  %v850_v1 = vmul.f32 %v1188_v55, %v1381_v25 }
 0x104   : > { %v1173_v62 = vpop.f32.mrb[6].mxu0  ;;  %v1189_v63 = vpop.f32.mrb[6].mxu1  ;;  %932 = vst [vmem:[%s1400_s24 + $0x8] sm:$0xff] %v900_v60  ;;  %948 = vst [vmem:[%s1400_s24 + $0x88] sm:$0xff] %v916_v61  ;;  %v832_v4 = vmul.f32 %v1381_v25, %v611_v58  ;;  %v848_v5 = vmul.f32 %v1381_v25, %v675_v59 }
 0x105   : > { %v614_v2 = vpop.f32.mrb[7].mxu0  ;;  %v678_v3 = vpop.f32.mrb[7].mxu1  ;;  %v873_v6 = vadd.f32 %v1386_v29, %v834_v0  ;;  %v889_v7 = vadd.f32 %v1386_v29, %v850_v1  ;;  %v835_v8 = vmul.f32 %v1173_v62, %v1381_v25  ;;  %v851_v9 = vmul.f32 %v1189_v63, %v1381_v25 }
 0x106   : > { %v871_v10 = vadd.f32 %v1386_v29, %v832_v4  ;;  %v887_v11 = vadd.f32 %v1386_v29, %v848_v5  ;;  %v833_v12 = vmul.f32 %v1381_v25, %v614_v2  ;;  %v849_v13 = vmul.f32 %v1381_v25, %v678_v3 }
 0x107   : > { %v905_v14 = vmax.f32 %v873_v6, 0.0  ;;  %v921_v15 = vmax.f32 %v889_v7, 0.0  ;;  %v874_v16 = vadd.f32 %v1386_v29, %v835_v8  ;;  %v890_v17 = vadd.f32 %v1386_v29, %v851_v9 }
 0x108   : > { %v903_v18 = vmax.f32 %v871_v10, 0.0  ;;  %v919_v19 = vmax.f32 %v887_v11, 0.0  ;;  %v872_v20 = vadd.f32 %v1386_v29, %v833_v12  ;;  %v888_v21 = vadd.f32 %v1386_v29, %v849_v13 }
 0x109   : > { %937 = vst [vmem:[%s1400_s24 + $0x30] sm:$0xff] %v905_v14  ;;  %953 = vst [vmem:[%s1400_s24 + $0xb0] sm:$0xff] %v921_v15  ;;  %v906_v24 = vmax.f32 %v874_v16, 0.0  ;;  %v922_v26 = vmax.f32 %v890_v17, 0.0 }
 0x10a   : > { %v1176_v22 = vpop.f32.mrb[8].mxu0  ;;  %v1192_v23 = vpop.f32.mrb[8].mxu1  ;;  %935 = vst [vmem:[%s1400_s24 + $0x20] sm:$0xff] %v903_v18  ;;  %951 = vst [vmem:[%s1400_s24 + $0xa0] sm:$0xff] %v919_v19  ;;  %v904_v30 = vmax.f32 %v872_v20, 0.0  ;;  %v920_v31 = vmax.f32 %v888_v21, 0.0 }
 0x10b   : > { %v627_v27 = vpop.f32.mrb[9].mxu0  ;;  %v691_v28 = vpop.f32.mrb[9].mxu1  ;;  %938 = vst [vmem:[%s1400_s24 + $0x38] sm:$0xff] %v906_v24  ;;  %954 = vst [vmem:[%s1400_s24 + $0xb8] sm:$0xff] %v922_v26  ;;  %v838_v34 = vmul.f32 %v1176_v22, %v1381_v25  ;;  %v854_v35 = vmul.f32 %v1192_v23, %v1381_v25 }
 0x10c   : > { %v1177_v32 = vpop.f32.mrb[10].mxu0  ;;  %v1193_v33 = vpop.f32.mrb[10].mxu1  ;;  %936 = vst [vmem:[%s1400_s24 + $0x28] sm:$0xff] %v904_v30  ;;  %952 = vst [vmem:[%s1400_s24 + $0xa8] sm:$0xff] %v920_v31  ;;  %v836_v38 = vmul.f32 %v1381_v25, %v627_v27  ;;  %v852_v39 = vmul.f32 %v1381_v25, %v691_v28 }
 0x10d   : > { %v630_v36 = vpop.f32.mrb[11].mxu0  ;;  %v694_v37 = vpop.f32.mrb[11].mxu1  ;;  %v877_v40 = vadd.f32 %v1386_v29, %v838_v34  ;;  %v893_v41 = vadd.f32 %v1386_v29, %v854_v35  ;;  %v839_v42 = vmul.f32 %v1177_v32, %v1381_v25  ;;  %v855_v43 = vmul.f32 %v1193_v33, %v1381_v25 }
 0x10e   : > { %v875_v44 = vadd.f32 %v1386_v29, %v836_v38  ;;  %v891_v45 = vadd.f32 %v1386_v29, %v852_v39  ;;  %v837_v46 = vmul.f32 %v1381_v25, %v630_v36  ;;  %v853_v47 = vmul.f32 %v1381_v25, %v694_v37 }
 0x10f   : > { %v909_v48 = vmax.f32 %v877_v40, 0.0  ;;  %v925_v49 = vmax.f32 %v893_v41, 0.0  ;;  %v878_v50 = vadd.f32 %v1386_v29, %v839_v42  ;;  %v894_v51 = vadd.f32 %v1386_v29, %v855_v43 }
 0x110   : > { %v907_v52 = vmax.f32 %v875_v44, 0.0  ;;  %v923_v53 = vmax.f32 %v891_v45, 0.0  ;;  %v876_v54 = vadd.f32 %v1386_v29, %v837_v46  ;;  %v892_v55 = vadd.f32 %v1386_v29, %v853_v47 }
 0x111   : > { %941 = vst [vmem:[%s1400_s24 + $0x50] sm:$0xff] %v909_v48  ;;  %957 = vst [vmem:[%s1400_s24 + $0xd0] sm:$0xff] %v925_v49  ;;  %v910_v58 = vmax.f32 %v878_v50, 0.0  ;;  %v926_v59 = vmax.f32 %v894_v51, 0.0 }
 0x112   : > { %v1180_v56 = vpop.f32.mrb[12].mxu0  ;;  %v1196_v57 = vpop.f32.mrb[12].mxu1  ;;  %939 = vst [vmem:[%s1400_s24 + $0x40] sm:$0xff] %v907_v52  ;;  %955 = vst [vmem:[%s1400_s24 + $0xc0] sm:$0xff] %v923_v53  ;;  %v908_v62 = vmax.f32 %v876_v54, 0.0  ;;  %v924_v63 = vmax.f32 %v892_v55, 0.0 }
 0x113   : > { %v643_v60 = vpop.f32.mrb[13].mxu0  ;;  %v707_v61 = vpop.f32.mrb[13].mxu1  ;;  %942 = vst [vmem:[%s1400_s24 + $0x58] sm:$0xff] %v910_v58  ;;  %958 = vst [vmem:[%s1400_s24 + $0xd8] sm:$0xff] %v926_v59  ;;  %v842_v2 = vmul.f32 %v1180_v56, %v1381_v25  ;;  %v858_v3 = vmul.f32 %v1196_v57, %v1381_v25 }
 0x114   : > { %v1181_v0 = vpop.f32.mrb[14].mxu0  ;;  %v1197_v1 = vpop.f32.mrb[14].mxu1  ;;  %940 = vst [vmem:[%s1400_s24 + $0x48] sm:$0xff] %v908_v62  ;;  %956 = vst [vmem:[%s1400_s24 + $0xc8] sm:$0xff] %v924_v63  ;;  %v840_v6 = vmul.f32 %v1381_v25, %v643_v60  ;;  %v856_v7 = vmul.f32 %v1381_v25, %v707_v61 }
 0x115   : > { %v646_v4 = vpop.f32.mrb[15].mxu0  ;;  %v710_v5 = vpop.f32.mrb[15].mxu1  ;;  %v881_v8 = vadd.f32 %v1386_v29, %v842_v2  ;;  %v897_v9 = vadd.f32 %v1386_v29, %v858_v3  ;;  %v843_v10 = vmul.f32 %v1181_v0, %v1381_v25  ;;  %v859_v11 = vmul.f32 %v1197_v1, %v1381_v25 }
 0x116   : > { %v879_v12 = vadd.f32 %v1386_v29, %v840_v6  ;;  %v895_v13 = vadd.f32 %v1386_v29, %v856_v7  ;;  %v841_v14 = vmul.f32 %v1381_v25, %v646_v4  ;;  %v857_v15 = vmul.f32 %v1381_v25, %v710_v5 }
 0x117   : > { %v913_v16 = vmax.f32 %v881_v8, 0.0  ;;  %v929_v17 = vmax.f32 %v897_v9, 0.0  ;;  %v882_v18 = vadd.f32 %v1386_v29, %v843_v10  ;;  %v898_v19 = vadd.f32 %v1386_v29, %v859_v11 }
 0x118   : > { %v911_v20 = vmax.f32 %v879_v12, 0.0  ;;  %v927_v21 = vmax.f32 %v895_v13, 0.0  ;;  %v880_v22 = vadd.f32 %v1386_v29, %v841_v14  ;;  %v896_v23 = vadd.f32 %v1386_v29, %v857_v15 }
 0x119   : > { %945 = vst [vmem:[%s1400_s24 + $0x70] sm:$0xff] %v913_v16  ;;  %961 = vst [vmem:[%s1400_s24 + $0xf0] sm:$0xff] %v929_v17  ;;  %v914_v24 = vmax.f32 %v882_v18, 0.0  ;;  %v930_v25 = vmax.f32 %v898_v19, 0.0 }
 0x11a   : > { %943 = vst [vmem:[%s1400_s24 + $0x60] sm:$0xff] %v911_v20  ;;  %959 = vst [vmem:[%s1400_s24 + $0xe0] sm:$0xff] %v927_v21  ;;  %v912_v26 = vmax.f32 %v880_v22, 0.0  ;;  %v928_v27 = vmax.f32 %v896_v23, 0.0 }
 0x11b   : > { %946 = vst [vmem:[%s1400_s24 + $0x78] sm:$0xff] %v914_v24  ;;  %962 = vst [vmem:[%s1400_s24 + $0xf8] sm:$0xff] %v930_v25 }
 0x11c   : > { %944 = vst [vmem:[%s1400_s24 + $0x68] sm:$0xff] %v912_v26  ;;  %960 = vst [vmem:[%s1400_s24 + $0xe8] sm:$0xff] %v928_v27 }
 0x11d PF: > { %s14_s17 = sadd.s32 1, %s1285_s17   ;;  %s1504_s15 = smov %s1281_s16 }
 0x11e   : > { %p11_p5 = scmp.ge.s32.totalorder %s14_s17, 10   ;;  %s1505_s16 = smov %s1507_s18 }
 0x120   :  { %13 = sbr.rel (!%p11_p5) target bundleno = 2 (0x2), region = 83 }

</bundles_post_ra>
